<compile_context>
chip_gen: v5e
topology: v5e:2x2
jax: 0.10.0
libtpu: 0.0.40
codegen_flags: <defaults>
</compile_context>

<pallas_src>
import functools

import jax
import jax.numpy as jnp
import numpy as np
from jax import lax
from jax.experimental import pallas as pl
from jax.experimental.pallas import tpu as pltpu

LANE = 128  # TPU vreg lane width


def masked_lstm_kernel(x_ref, m_ref, wih_ref, whh_ref, b_ref, wfc_ref, bfc_ref,
                       o_ref, h_sc, c_sc, xg_sc, msk_sc, *, t_chunk, batch, hp):
    """One grid step processes a chunk of `t_chunk` timesteps.

    x_ref   : (t_chunk*B, I)     bf16, time-major chunk
    m_ref   : (t_chunk*B, 1)     f32 0/1 mask chunk
    wih_ref : (I, 4*hp)          bf16  W_ih^T, gates packed contiguously
    whh_ref : (hp, 4*hp)         bf16  W_hh^T, packed
    b_ref   : (1, 4*hp)          f32   b_ih + b_hh, packed
    wfc_ref : (hp, O_pad)        f32   W_fc^T
    bfc_ref : (1, O_pad)         f32
    o_ref   : (B, O_pad)         f32   lane-dense output slab
    h_sc/c_sc : (B, hp)          f32   carried LSTM state (persists across chunks)
    xg_sc   : (t_chunk*B, 4*hp)  f32   hoisted input projection for the chunk
    msk_sc  : (t_chunk*B, hp)    f32   lane-expanded mask for the chunk
    """
    ci = pl.program_id(0)
    nc = pl.num_programs(0)

    @pl.when(ci == 0)
    def _():
        h_sc[...] = jnp.zeros_like(h_sc)
        c_sc[...] = jnp.zeros_like(c_sc)

    # ---- Phase 1 (per chunk): hoisted input projection for every timestep in
    #      the chunk (one GEMM, bias folded in), bf16 operands / f32 accumulate,
    #      and a one-time lane expansion of the mask.
    xg_sc[...] = (
        jnp.dot(x_ref[...], wih_ref[...], preferred_element_type=jnp.float32)
        + b_ref[...])
    msk_sc[...] = jnp.broadcast_to(m_ref[...], msk_sc.shape)

    whh = whh_ref[...]  # (hp, 4*hp) bf16 — tiny, held resident across the loop

    def step(t, carry):
        h, c = carry                                   # (B, hp) f32
        row = pl.multiple_of(t * batch, batch)         # sublane-aligned start
        xg_t = xg_sc[pl.ds(row, batch), :]             # (B, 4*hp), precomputed
        m_t = msk_sc[pl.ds(row, batch), :] != 0.0      # (B, hp) bool, no broadcast

        # Only the recurrent matmul remains on the serial path (bf16 x bf16 -> f32).
        gates = xg_t + jnp.dot(h.astype(jnp.bfloat16), whh,
                               preferred_element_type=jnp.float32)

        # Two full-width EUP passes over the packed gate block, then static
        # lane slices per gate (PyTorch order i, f, g, o).
        sig = jax.nn.sigmoid(gates)
        th = jnp.tanh(gates)
        i_g = sig[:, 0 * hp:1 * hp]
        f_g = sig[:, 1 * hp:2 * hp]
        g_g = th[:, 2 * hp:3 * hp]
        o_g = sig[:, 3 * hp:4 * hp]

        c_new = f_g * c + i_g * g_g
        h_new = o_g * jnp.tanh(c_new)

        # mask is strictly 0/1 -> select is equivalent to the arithmetic blend
        h = jnp.where(m_t, h_new, h)
        c = jnp.where(m_t, c_new, c)
        return h, c

    h0 = h_sc[...]
    c0 = c_sc[...]
    h, c = lax.fori_loop(0, t_chunk, step, (h0, c0),
                         unroll=True if t_chunk <= 8 else 8)
    h_sc[...] = h
    c_sc[...] = c

    # ---- Final FC + ReLU into a lane-dense (B, O_pad) slab (last chunk only).
    @pl.when(ci == nc - 1)
    def _():
        out = jnp.dot(h, wfc_ref[...],
                      preferred_element_type=jnp.float32) + bfc_ref[...]
        o_ref[...] = jnp.maximum(out, 0.0).astype(o_ref.dtype)


def prepare_kernel_params(raw_params, lane=LANE):
    """Pad/transpose torch-layout params into the packed, lane-aligned layout."""
    w_ih, w_hh, b_ih, b_hh, w_fc, b_fc = raw_params
    four_h, in_size = w_ih.shape
    H = four_h // 4
    O = w_fc.shape[0]
    Hp = ((H + 31) // 32) * 32          # 4*Hp is a multiple of 128 lanes
    Op = ((O + lane - 1) // lane) * lane

    b = b_ih + b_hh
    wih_p = jnp.zeros((in_size, 4 * Hp), jnp.float32)
    whh_p = jnp.zeros((Hp, 4 * Hp), jnp.float32)
    b_p = jnp.zeros((1, 4 * Hp), jnp.float32)
    for g in range(4):                  # PyTorch gate order i, f, g, o
        wih_p = wih_p.at[:, g * Hp:g * Hp + H].set(w_ih[g * H:(g + 1) * H, :].T)
        whh_p = whh_p.at[:H, g * Hp:g * Hp + H].set(w_hh[g * H:(g + 1) * H, :].T)
        b_p = b_p.at[0, g * Hp:g * Hp + H].set(b[g * H:(g + 1) * H])

    wfc_p = jnp.zeros((Hp, Op), jnp.float32).at[:H, :O].set(w_fc.T)
    bfc_p = jnp.zeros((1, Op), jnp.float32).at[0, :O].set(b_fc)

    # Matmul operands in bf16 (padding zeros are exact in bf16); everything on
    # the elementwise path stays f32.
    return dict(wih=wih_p.astype(jnp.bfloat16), whh=whh_p.astype(jnp.bfloat16),
                b=b_p, wfc=wfc_p, bfc=bfc_p,
                H_pad=Hp, O_pad=Op, out_size=O)


def _pick_t_chunk(T, B, I, Hp, budget_bytes=8 << 20):
    """Largest divisor of T whose chunk-resident VMEM fits the budget."""
    per_t = B * (2 * (2 * I)       # bf16 x chunk, double-buffered
                 + 2 * 4           # mask chunk, double-buffered
                 + 4 * Hp * 4      # hoisted gate scratch (f32)
                 + Hp * 4)         # lane-expanded mask scratch (f32)
    choice = T
    for d in range(T, 0, -1):
        if T % d != 0:
            continue
        if d != T and (d * B) % 8 != 0:    # keep chunk sublane-aligned
            continue
        choice = d
        if d * per_t <= budget_bytes:
            break
    return choice


def masked_lstm_forward(x, mask, kp, t_chunk=None):
    """x: (B, T, I) f32, mask: (B, T) f32 -> (B, output_size) f32."""
    B, T, I = x.shape
    Hp, Op, O = kp["H_pad"], kp["O_pad"], kp["out_size"]

    # TODO(synk): at production sizes express time-major access through the
    # BlockSpec index_map on the original (B, T, I) layout to avoid this XLA
    # transpose round trip through HBM (negligible at toy size).
    x_tm = jnp.transpose(x, (1, 0, 2)).reshape(T * B, I).astype(jnp.bfloat16)
    m_tm = jnp.transpose(mask, (1, 0)).reshape(T * B, 1).astype(jnp.float32)

    if t_chunk is None:
        t_chunk = _pick_t_chunk(T, B, I, Hp)
    num_chunks = T // t_chunk
    rows = t_chunk * B

    kernel = functools.partial(masked_lstm_kernel,
                               t_chunk=t_chunk, batch=B, hp=Hp)

    def full_spec(arr):
        return pl.BlockSpec(arr.shape, lambda c: (0, 0))

    out_pad = pl.pallas_call(
        kernel,
        out_shape=jax.ShapeDtypeStruct((B, Op), jnp.float32),
        grid_spec=pltpu.PrefetchScalarGridSpec(
            num_scalar_prefetch=0,
            grid=(num_chunks,),
            in_specs=[
                pl.BlockSpec((rows, I), lambda c: (c, 0)),   # x chunk
                pl.BlockSpec((rows, 1), lambda c: (c, 0)),   # mask chunk
                full_spec(kp["wih"]),
                full_spec(kp["whh"]),
                full_spec(kp["b"]),
                full_spec(kp["wfc"]),
                full_spec(kp["bfc"]),
            ],
            out_specs=pl.BlockSpec((B, Op), lambda c: (0, 0)),
            scratch_shapes=[
                pltpu.VMEM((B, Hp), jnp.float32),            # h carry
                pltpu.VMEM((B, Hp), jnp.float32),            # c carry
                pltpu.VMEM((rows, 4 * Hp), jnp.float32),     # hoisted gates
                pltpu.VMEM((rows, Hp), jnp.float32),         # expanded mask
            ]),
        compiler_params=pltpu.CompilerParams(
            dimension_semantics=("arbitrary",),
            vmem_limit_bytes=32 * 1024 * 1024),
    )(x_tm, m_tm, kp["wih"], kp["whh"], kp["b"], kp["wfc"], kp["bfc"])

    return out_pad[:, :O]


def init_raw_params(key, input_size, hidden_size, output_size):
    """Torch-layout parameters: weights ~ xavier_normal, biases = 0.1."""
    k1, k2, k3 = jax.random.split(key, 3)

    def xavier_normal(k, shape):  # shape = (fan_out, fan_in) like torch
        fan_out, fan_in = shape
        std = float(np.sqrt(2.0 / (fan_in + fan_out)))
        return std * jax.random.normal(k, shape, dtype=jnp.float32)

    w_ih = xavier_normal(k1, (4 * hidden_size, input_size))     # weight_ih_l0
    w_hh = xavier_normal(k2, (4 * hidden_size, hidden_size))    # weight_hh_l0
    b_ih = jnp.full((4 * hidden_size,), 0.1, dtype=jnp.float32)
    b_hh = jnp.full((4 * hidden_size,), 0.1, dtype=jnp.float32)
    w_fc = xavier_normal(k3, (output_size, hidden_size))        # fc.weight
    b_fc = jnp.full((output_size,), 0.1, dtype=jnp.float32)
    return (w_ih, w_hh, b_ih, b_hh, w_fc, b_fc)


def reference_forward(x, mask, raw_params):
    """Pure-JAX f32 reference of the PyTorch forward for verification."""
    w_ih, w_hh, b_ih, b_hh, w_fc, b_fc = raw_params
    B, T, _ = x.shape
    H = w_hh.shape[1]
    h = jnp.zeros((B, H), jnp.float32)
    c = jnp.zeros((B, H), jnp.float32)
    b = b_ih + b_hh
    for t in range(T):
        x_t = x[:, t, :]
        m_t = mask[:, t][:, None]
        gates = x_t @ w_ih.T + h @ w_hh.T + b
        i_g = jax.nn.sigmoid(gates[:, 0 * H:1 * H])
        f_g = jax.nn.sigmoid(gates[:, 1 * H:2 * H])
        g_g = jnp.tanh(gates[:, 2 * H:3 * H])
        o_g = jax.nn.sigmoid(gates[:, 3 * H:4 * H])
        c_new = f_g * c + i_g * g_g
        h_new = o_g * jnp.tanh(c_new)
        h = m_t * h_new + (1.0 - m_t) * h
        c = m_t * c_new + (1.0 - m_t) * c
    return jnp.maximum(h @ w_fc.T + b_fc, 0.0)


if __name__ == "__main__":
    batch, seq_len = 8, 8
    input_size, hidden_size, output_size = 16, 32, 8

    key = jax.random.PRNGKey(0)
    kx, km, kparam = jax.random.split(key, 3)

    x = jax.random.normal(kx, (batch, seq_len, input_size), dtype=jnp.float32)
    # binary mask with some padded (zero) timesteps, as float (mask.float() in torch)
    mask = (jax.random.uniform(km, (batch, seq_len)) > 0.25).astype(jnp.float32)

    raw_params = init_raw_params(kparam, input_size, hidden_size, output_size)
    kparams = prepare_kernel_params(raw_params)

    out = masked_lstm_forward(x, mask, kparams)
    out = jax.block_until_ready(out)

    ref = reference_forward(x, mask, raw_params)
    # bf16 matmul operands (f32 accumulation) -> relaxed tolerance vs. the f32 reference
    np.testing.assert_allclose(np.asarray(out), np.asarray(ref), rtol=2e-2, atol=2e-2)

    print("KERNEL_OK")
</pallas_src>

<mosaic_0001>
module attributes {stable_mosaic.version = 11 : i64} {
  func.func @masked_lstm_kernel(%arg0: i32, %arg1: memref<64x16xbf16, #tpu.memory_space<vmem>>, %arg2: memref<64x1xf32, #tpu.memory_space<vmem>>, %arg3: memref<16x128xbf16, #tpu.memory_space<vmem>>, %arg4: memref<32x128xbf16, #tpu.memory_space<vmem>>, %arg5: memref<1x128xf32, #tpu.memory_space<vmem>>, %arg6: memref<32x128xf32, #tpu.memory_space<vmem>>, %arg7: memref<1x128xf32, #tpu.memory_space<vmem>>, %arg8: memref<8x128xf32, #tpu.memory_space<vmem>>, %arg9: memref<8x32xf32, #tpu.memory_space<vmem>>, %arg10: memref<8x32xf32, #tpu.memory_space<vmem>>, %arg11: memref<64x128xf32, #tpu.memory_space<vmem>>, %arg12: memref<64x32xf32, #tpu.memory_space<vmem>>) attributes {dimension_semantics = [#tpu.dimension_semantics<arbitrary>], iteration_bounds = array<i64: 1>, scalar_prefetch = 0 : i64, scratch_operands = 4 : i64, tpu.core_type = #tpu.core_type<tc>, window_params = [{transform_indices = @transform_0, window_bounds = array<i64: 64, 16>}, {transform_indices = @transform_1, window_bounds = array<i64: 64, 1>}, {pipeline_mode = #tpu.pipeline_mode<synchronous>, transform_indices = @transform_2, window_bounds = array<i64: 16, 128>}, {pipeline_mode = #tpu.pipeline_mode<synchronous>, transform_indices = @transform_3, window_bounds = array<i64: 32, 128>}, {pipeline_mode = #tpu.pipeline_mode<synchronous>, transform_indices = @transform_4, window_bounds = array<i64: 1, 128>}, {pipeline_mode = #tpu.pipeline_mode<synchronous>, transform_indices = @transform_5, window_bounds = array<i64: 32, 128>}, {pipeline_mode = #tpu.pipeline_mode<synchronous>, transform_indices = @transform_6, window_bounds = array<i64: 1, 128>}, {pipeline_mode = #tpu.pipeline_mode<synchronous>, transform_indices = @transform_7, window_bounds = array<i64: 8, 128>}]} {
    %c0_i32 = arith.constant 0 : i32
    %0 = arith.cmpi eq, %arg0, %c0_i32 : i32
    %1 = arith.extui %0 : i1 to i32
    %c0_i32_0 = arith.constant 0 : i32
    %2 = arith.cmpi ne, %1, %c0_i32_0 : i32
    scf.if %2 {
      %cst_73 = arith.constant 0.000000e+00 : f32
      %246 = vector.broadcast %cst_73 : f32 to vector<8x32xf32>
      %c0_74 = arith.constant 0 : index
      %c0_75 = arith.constant 0 : index
      %247 = vector.load %arg9[%c0_74, %c0_75] : memref<8x32xf32, #tpu.memory_space<vmem>>, vector<8x32xf32>
      tpu.vector_store %arg9[%c0_74, %c0_75], %246 {strides = array<i32>} : memref<8x32xf32, #tpu.memory_space<vmem>>, vector<8x32xf32>,
      %cst_76 = arith.constant 0.000000e+00 : f32
      %248 = vector.broadcast %cst_76 : f32 to vector<8x32xf32>
      %c0_77 = arith.constant 0 : index
      %c0_78 = arith.constant 0 : index
      %249 = vector.load %arg10[%c0_77, %c0_78] : memref<8x32xf32, #tpu.memory_space<vmem>>, vector<8x32xf32>
      tpu.vector_store %arg10[%c0_77, %c0_78], %248 {strides = array<i32>} : memref<8x32xf32, #tpu.memory_space<vmem>>, vector<8x32xf32>,
    } else {
    }
    %c0 = arith.constant 0 : index
    %c0_1 = arith.constant 0 : index
    %3 = vector.load %arg1[%c0, %c0_1] : memref<64x16xbf16, #tpu.memory_space<vmem>>, vector<64x16xbf16>
    %c0_2 = arith.constant 0 : index
    %c0_3 = arith.constant 0 : index
    %4 = vector.load %arg3[%c0_2, %c0_3] : memref<16x128xbf16, #tpu.memory_space<vmem>>, vector<16x128xbf16>
    %cst = arith.constant dense<0.000000e+00> : vector<64x128xf32>
    %5 = tpu.matmul %3, %4, %cst {dimension_numbers = #tpu.dot_dimension_numbers<[1], [0], [0], [1], [0, 0, 1, 1], [], []>} : vector<64x16xbf16>, vector<16x128xbf16>, vector<64x128xf32> -> vector<64x128xf32>
    %c0_4 = arith.constant 0 : index
    %c0_5 = arith.constant 0 : index
    %6 = vector.load %arg5[%c0_4, %c0_5] : memref<1x128xf32, #tpu.memory_space<vmem>>, vector<1x128xf32>
    %7 = vector.broadcast %6 : vector<1x128xf32> to vector<64x128xf32>
    %8 = arith.addf %5, %7 : vector<64x128xf32>
    %c0_6 = arith.constant 0 : index
    %c0_7 = arith.constant 0 : index
    %9 = vector.load %arg11[%c0_6, %c0_7] : memref<64x128xf32, #tpu.memory_space<vmem>>, vector<64x128xf32>
    tpu.vector_store %arg11[%c0_6, %c0_7], %8 {strides = array<i32>} : memref<64x128xf32, #tpu.memory_space<vmem>>, vector<64x128xf32>,
    %c0_8 = arith.constant 0 : index
    %c0_9 = arith.constant 0 : index
    %10 = vector.load %arg2[%c0_8, %c0_9] : memref<64x1xf32, #tpu.memory_space<vmem>>, vector<64x1xf32>
    %11 = vector.shape_cast %10 : vector<64x1xf32> to vector<64x1xf32>
    %12 = vector.broadcast %11 : vector<64x1xf32> to vector<64x32xf32>
    %c0_10 = arith.constant 0 : index
    %c0_11 = arith.constant 0 : index
    %13 = vector.load %arg12[%c0_10, %c0_11] : memref<64x32xf32, #tpu.memory_space<vmem>>, vector<64x32xf32>
    tpu.vector_store %arg12[%c0_10, %c0_11], %12 {strides = array<i32>} : memref<64x32xf32, #tpu.memory_space<vmem>>, vector<64x32xf32>,
    %c0_12 = arith.constant 0 : index
    %c0_13 = arith.constant 0 : index
    %14 = vector.load %arg4[%c0_12, %c0_13] : memref<32x128xbf16, #tpu.memory_space<vmem>>, vector<32x128xbf16>
    %c0_14 = arith.constant 0 : index
    %c0_15 = arith.constant 0 : index
    %15 = vector.load %arg9[%c0_14, %c0_15] : memref<8x32xf32, #tpu.memory_space<vmem>>, vector<8x32xf32>
    %c0_16 = arith.constant 0 : index
    %c0_17 = arith.constant 0 : index
    %16 = vector.load %arg10[%c0_16, %c0_17] : memref<8x32xf32, #tpu.memory_space<vmem>>, vector<8x32xf32>
    %c0_i32_18 = arith.constant 0 : i32
    %c8_i32 = arith.constant 8 : i32
    %17 = arith.muli %c0_i32_18, %c8_i32 : i32
    %18 = tpu.assume_multiple %17, 8 : i32
    %19 = arith.index_cast %18 : i32 to index
    %c0_19 = arith.constant 0 : index
    %20 = vector.load %arg11[%19, %c0_19] : memref<64x128xf32, #tpu.memory_space<vmem>>, vector<8x128xf32>
    %21 = arith.index_cast %18 : i32 to index
    %c0_20 = arith.constant 0 : index
    %22 = vector.load %arg12[%21, %c0_20] : memref<64x32xf32, #tpu.memory_space<vmem>>, vector<8x32xf32>
    %cst_21 = arith.constant 0.000000e+00 : f32
    %23 = vector.broadcast %cst_21 : f32 to vector<8x32xf32>
    %24 = arith.cmpf one, %22, %23 : vector<8x32xf32>
    %25 = arith.truncf %15 : vector<8x32xf32> to vector<8x32xbf16>
    %cst_22 = arith.constant dense<0.000000e+00> : vector<8x128xf32>
    %26 = tpu.matmul %25, %14, %cst_22 {dimension_numbers = #tpu.dot_dimension_numbers<[1], [0], [0], [1], [0, 0, 1, 1], [], []>} : vector<8x32xbf16>, vector<32x128xbf16>, vector<8x128xf32> -> vector<8x128xf32>
    %27 = arith.addf %20, %26 : vector<8x128xf32>
    %28 = arith.negf %27 : vector<8x128xf32>
    %29 = math.exp %28 : vector<8x128xf32>
    %cst_23 = arith.constant 1.000000e+00 : f32
    %30 = vector.broadcast %cst_23 : f32 to vector<8x128xf32>
    %31 = arith.addf %30, %29 : vector<8x128xf32>
    %32 = arith.divf %30, %31 : vector<8x128xf32>
    %33 = math.tanh %27 : vector<8x128xf32>
    %34 = vector.extract_strided_slice %32 {offsets = [0, 0], sizes = [8, 32], strides = [1, 1]} : vector<8x128xf32> to vector<8x32xf32>
    %35 = vector.extract_strided_slice %32 {offsets = [0, 32], sizes = [8, 32], strides = [1, 1]} : vector<8x128xf32> to vector<8x32xf32>
    %36 = vector.extract_strided_slice %33 {offsets = [0, 64], sizes = [8, 32], strides = [1, 1]} : vector<8x128xf32> to vector<8x32xf32>
    %37 = vector.extract_strided_slice %32 {offsets = [0, 96], sizes = [8, 32], strides = [1, 1]} : vector<8x128xf32> to vector<8x32xf32>
    %38 = arith.mulf %35, %16 : vector<8x32xf32>
    %39 = arith.mulf %34, %36 : vector<8x32xf32>
    %40 = arith.addf %38, %39 : vector<8x32xf32>
    %41 = math.tanh %40 : vector<8x32xf32>
    %42 = arith.mulf %37, %41 : vector<8x32xf32>
    %43 = arith.select %24, %42, %15 : vector<8x32xi1>, vector<8x32xf32>
    %44 = arith.select %24, %40, %16 : vector<8x32xi1>, vector<8x32xf32>
    %c1_i32 = arith.constant 1 : i32
    %c8_i32_24 = arith.constant 8 : i32
    %45 = arith.muli %c1_i32, %c8_i32_24 : i32
    %46 = tpu.assume_multiple %45, 8 : i32
    %47 = arith.index_cast %46 : i32 to index
    %c0_25 = arith.constant 0 : index
    %48 = vector.load %arg11[%47, %c0_25] : memref<64x128xf32, #tpu.memory_space<vmem>>, vector<8x128xf32>
    %49 = arith.index_cast %46 : i32 to index
    %c0_26 = arith.constant 0 : index
    %50 = vector.load %arg12[%49, %c0_26] : memref<64x32xf32, #tpu.memory_space<vmem>>, vector<8x32xf32>
    %cst_27 = arith.constant 0.000000e+00 : f32
    %51 = vector.broadcast %cst_27 : f32 to vector<8x32xf32>
    %52 = arith.cmpf one, %50, %51 : vector<8x32xf32>
    %53 = arith.truncf %43 : vector<8x32xf32> to vector<8x32xbf16>
    %cst_28 = arith.constant dense<0.000000e+00> : vector<8x128xf32>
    %54 = tpu.matmul %53, %14, %cst_28 {dimension_numbers = #tpu.dot_dimension_numbers<[1], [0], [0], [1], [0, 0, 1, 1], [], []>} : vector<8x32xbf16>, vector<32x128xbf16>, vector<8x128xf32> -> vector<8x128xf32>
    %55 = arith.addf %48, %54 : vector<8x128xf32>
    %56 = arith.negf %55 : vector<8x128xf32>
    %57 = math.exp %56 : vector<8x128xf32>
    %cst_29 = arith.constant 1.000000e+00 : f32
    %58 = vector.broadcast %cst_29 : f32 to vector<8x128xf32>
    %59 = arith.addf %58, %57 : vector<8x128xf32>
    %60 = arith.divf %58, %59 : vector<8x128xf32>
    %61 = math.tanh %55 : vector<8x128xf32>
    %62 = vector.extract_strided_slice %60 {offsets = [0, 0], sizes = [8, 32], strides = [1, 1]} : vector<8x128xf32> to vector<8x32xf32>
    %63 = vector.extract_strided_slice %60 {offsets = [0, 32], sizes = [8, 32], strides = [1, 1]} : vector<8x128xf32> to vector<8x32xf32>
    %64 = vector.extract_strided_slice %61 {offsets = [0, 64], sizes = [8, 32], strides = [1, 1]} : vector<8x128xf32> to vector<8x32xf32>
    %65 = vector.extract_strided_slice %60 {offsets = [0, 96], sizes = [8, 32], strides = [1, 1]} : vector<8x128xf32> to vector<8x32xf32>
    %66 = arith.mulf %63, %44 : vector<8x32xf32>
    %67 = arith.mulf %62, %64 : vector<8x32xf32>
    %68 = arith.addf %66, %67 : vector<8x32xf32>
    %69 = math.tanh %68 : vector<8x32xf32>
    %70 = arith.mulf %65, %69 : vector<8x32xf32>
    %71 = arith.select %52, %70, %43 : vector<8x32xi1>, vector<8x32xf32>
    %72 = arith.select %52, %68, %44 : vector<8x32xi1>, vector<8x32xf32>
    %c2_i32 = arith.constant 2 : i32
    %c8_i32_30 = arith.constant 8 : i32
    %73 = arith.muli %c2_i32, %c8_i32_30 : i32
    %74 = tpu.assume_multiple %73, 8 : i32
    %75 = arith.index_cast %74 : i32 to index
    %c0_31 = arith.constant 0 : index
    %76 = vector.load %arg11[%75, %c0_31] : memref<64x128xf32, #tpu.memory_space<vmem>>, vector<8x128xf32>
    %77 = arith.index_cast %74 : i32 to index
    %c0_32 = arith.constant 0 : index
    %78 = vector.load %arg12[%77, %c0_32] : memref<64x32xf32, #tpu.memory_space<vmem>>, vector<8x32xf32>
    %cst_33 = arith.constant 0.000000e+00 : f32
    %79 = vector.broadcast %cst_33 : f32 to vector<8x32xf32>
    %80 = arith.cmpf one, %78, %79 : vector<8x32xf32>
    %81 = arith.truncf %71 : vector<8x32xf32> to vector<8x32xbf16>
    %cst_34 = arith.constant dense<0.000000e+00> : vector<8x128xf32>
    %82 = tpu.matmul %81, %14, %cst_34 {dimension_numbers = #tpu.dot_dimension_numbers<[1], [0], [0], [1], [0, 0, 1, 1], [], []>} : vector<8x32xbf16>, vector<32x128xbf16>, vector<8x128xf32> -> vector<8x128xf32>
    %83 = arith.addf %76, %82 : vector<8x128xf32>
    %84 = arith.negf %83 : vector<8x128xf32>
    %85 = math.exp %84 : vector<8x128xf32>
    %cst_35 = arith.constant 1.000000e+00 : f32
    %86 = vector.broadcast %cst_35 : f32 to vector<8x128xf32>
    %87 = arith.addf %86, %85 : vector<8x128xf32>
    %88 = arith.divf %86, %87 : vector<8x128xf32>
    %89 = math.tanh %83 : vector<8x128xf32>
    %90 = vector.extract_strided_slice %88 {offsets = [0, 0], sizes = [8, 32], strides = [1, 1]} : vector<8x128xf32> to vector<8x32xf32>
    %91 = vector.extract_strided_slice %88 {offsets = [0, 32], sizes = [8, 32], strides = [1, 1]} : vector<8x128xf32> to vector<8x32xf32>
    %92 = vector.extract_strided_slice %89 {offsets = [0, 64], sizes = [8, 32], strides = [1, 1]} : vector<8x128xf32> to vector<8x32xf32>
    %93 = vector.extract_strided_slice %88 {offsets = [0, 96], sizes = [8, 32], strides = [1, 1]} : vector<8x128xf32> to vector<8x32xf32>
    %94 = arith.mulf %91, %72 : vector<8x32xf32>
    %95 = arith.mulf %90, %92 : vector<8x32xf32>
    %96 = arith.addf %94, %95 : vector<8x32xf32>
    %97 = math.tanh %96 : vector<8x32xf32>
    %98 = arith.mulf %93, %97 : vector<8x32xf32>
    %99 = arith.select %80, %98, %71 : vector<8x32xi1>, vector<8x32xf32>
    %100 = arith.select %80, %96, %72 : vector<8x32xi1>, vector<8x32xf32>
    %c3_i32 = arith.constant 3 : i32
    %c8_i32_36 = arith.constant 8 : i32
    %101 = arith.muli %c3_i32, %c8_i32_36 : i32
    %102 = tpu.assume_multiple %101, 8 : i32
    %103 = arith.index_cast %102 : i32 to index
    %c0_37 = arith.constant 0 : index
    %104 = vector.load %arg11[%103, %c0_37] : memref<64x128xf32, #tpu.memory_space<vmem>>, vector<8x128xf32>
    %105 = arith.index_cast %102 : i32 to index
    %c0_38 = arith.constant 0 : index
    %106 = vector.load %arg12[%105, %c0_38] : memref<64x32xf32, #tpu.memory_space<vmem>>, vector<8x32xf32>
    %cst_39 = arith.constant 0.000000e+00 : f32
    %107 = vector.broadcast %cst_39 : f32 to vector<8x32xf32>
    %108 = arith.cmpf one, %106, %107 : vector<8x32xf32>
    %109 = arith.truncf %99 : vector<8x32xf32> to vector<8x32xbf16>
    %cst_40 = arith.constant dense<0.000000e+00> : vector<8x128xf32>
    %110 = tpu.matmul %109, %14, %cst_40 {dimension_numbers = #tpu.dot_dimension_numbers<[1], [0], [0], [1], [0, 0, 1, 1], [], []>} : vector<8x32xbf16>, vector<32x128xbf16>, vector<8x128xf32> -> vector<8x128xf32>
    %111 = arith.addf %104, %110 : vector<8x128xf32>
    %112 = arith.negf %111 : vector<8x128xf32>
    %113 = math.exp %112 : vector<8x128xf32>
    %cst_41 = arith.constant 1.000000e+00 : f32
    %114 = vector.broadcast %cst_41 : f32 to vector<8x128xf32>
    %115 = arith.addf %114, %113 : vector<8x128xf32>
    %116 = arith.divf %114, %115 : vector<8x128xf32>
    %117 = math.tanh %111 : vector<8x128xf32>
    %118 = vector.extract_strided_slice %116 {offsets = [0, 0], sizes = [8, 32], strides = [1, 1]} : vector<8x128xf32> to vector<8x32xf32>
    %119 = vector.extract_strided_slice %116 {offsets = [0, 32], sizes = [8, 32], strides = [1, 1]} : vector<8x128xf32> to vector<8x32xf32>
    %120 = vector.extract_strided_slice %117 {offsets = [0, 64], sizes = [8, 32], strides = [1, 1]} : vector<8x128xf32> to vector<8x32xf32>
    %121 = vector.extract_strided_slice %116 {offsets = [0, 96], sizes = [8, 32], strides = [1, 1]} : vector<8x128xf32> to vector<8x32xf32>
    %122 = arith.mulf %119, %100 : vector<8x32xf32>
    %123 = arith.mulf %118, %120 : vector<8x32xf32>
    %124 = arith.addf %122, %123 : vector<8x32xf32>
    %125 = math.tanh %124 : vector<8x32xf32>
    %126 = arith.mulf %121, %125 : vector<8x32xf32>
    %127 = arith.select %108, %126, %99 : vector<8x32xi1>, vector<8x32xf32>
    %128 = arith.select %108, %124, %100 : vector<8x32xi1>, vector<8x32xf32>
    %c4_i32 = arith.constant 4 : i32
    %c8_i32_42 = arith.constant 8 : i32
    %129 = arith.muli %c4_i32, %c8_i32_42 : i32
    %130 = tpu.assume_multiple %129, 8 : i32
    %131 = arith.index_cast %130 : i32 to index
    %c0_43 = arith.constant 0 : index
    %132 = vector.load %arg11[%131, %c0_43] : memref<64x128xf32, #tpu.memory_space<vmem>>, vector<8x128xf32>
    %133 = arith.index_cast %130 : i32 to index
    %c0_44 = arith.constant 0 : index
    %134 = vector.load %arg12[%133, %c0_44] : memref<64x32xf32, #tpu.memory_space<vmem>>, vector<8x32xf32>
    %cst_45 = arith.constant 0.000000e+00 : f32
    %135 = vector.broadcast %cst_45 : f32 to vector<8x32xf32>
    %136 = arith.cmpf one, %134, %135 : vector<8x32xf32>
    %137 = arith.truncf %127 : vector<8x32xf32> to vector<8x32xbf16>
    %cst_46 = arith.constant dense<0.000000e+00> : vector<8x128xf32>
    %138 = tpu.matmul %137, %14, %cst_46 {dimension_numbers = #tpu.dot_dimension_numbers<[1], [0], [0], [1], [0, 0, 1, 1], [], []>} : vector<8x32xbf16>, vector<32x128xbf16>, vector<8x128xf32> -> vector<8x128xf32>
    %139 = arith.addf %132, %138 : vector<8x128xf32>
    %140 = arith.negf %139 : vector<8x128xf32>
    %141 = math.exp %140 : vector<8x128xf32>
    %cst_47 = arith.constant 1.000000e+00 : f32
    %142 = vector.broadcast %cst_47 : f32 to vector<8x128xf32>
    %143 = arith.addf %142, %141 : vector<8x128xf32>
    %144 = arith.divf %142, %143 : vector<8x128xf32>
    %145 = math.tanh %139 : vector<8x128xf32>
    %146 = vector.extract_strided_slice %144 {offsets = [0, 0], sizes = [8, 32], strides = [1, 1]} : vector<8x128xf32> to vector<8x32xf32>
    %147 = vector.extract_strided_slice %144 {offsets = [0, 32], sizes = [8, 32], strides = [1, 1]} : vector<8x128xf32> to vector<8x32xf32>
    %148 = vector.extract_strided_slice %145 {offsets = [0, 64], sizes = [8, 32], strides = [1, 1]} : vector<8x128xf32> to vector<8x32xf32>
    %149 = vector.extract_strided_slice %144 {offsets = [0, 96], sizes = [8, 32], strides = [1, 1]} : vector<8x128xf32> to vector<8x32xf32>
    %150 = arith.mulf %147, %128 : vector<8x32xf32>
    %151 = arith.mulf %146, %148 : vector<8x32xf32>
    %152 = arith.addf %150, %151 : vector<8x32xf32>
    %153 = math.tanh %152 : vector<8x32xf32>
    %154 = arith.mulf %149, %153 : vector<8x32xf32>
    %155 = arith.select %136, %154, %127 : vector<8x32xi1>, vector<8x32xf32>
    %156 = arith.select %136, %152, %128 : vector<8x32xi1>, vector<8x32xf32>
    %c5_i32 = arith.constant 5 : i32
    %c8_i32_48 = arith.constant 8 : i32
    %157 = arith.muli %c5_i32, %c8_i32_48 : i32
    %158 = tpu.assume_multiple %157, 8 : i32
    %159 = arith.index_cast %158 : i32 to index
    %c0_49 = arith.constant 0 : index
    %160 = vector.load %arg11[%159, %c0_49] : memref<64x128xf32, #tpu.memory_space<vmem>>, vector<8x128xf32>
    %161 = arith.index_cast %158 : i32 to index
    %c0_50 = arith.constant 0 : index
    %162 = vector.load %arg12[%161, %c0_50] : memref<64x32xf32, #tpu.memory_space<vmem>>, vector<8x32xf32>
    %cst_51 = arith.constant 0.000000e+00 : f32
    %163 = vector.broadcast %cst_51 : f32 to vector<8x32xf32>
    %164 = arith.cmpf one, %162, %163 : vector<8x32xf32>
    %165 = arith.truncf %155 : vector<8x32xf32> to vector<8x32xbf16>
    %cst_52 = arith.constant dense<0.000000e+00> : vector<8x128xf32>
    %166 = tpu.matmul %165, %14, %cst_52 {dimension_numbers = #tpu.dot_dimension_numbers<[1], [0], [0], [1], [0, 0, 1, 1], [], []>} : vector<8x32xbf16>, vector<32x128xbf16>, vector<8x128xf32> -> vector<8x128xf32>
    %167 = arith.addf %160, %166 : vector<8x128xf32>
    %168 = arith.negf %167 : vector<8x128xf32>
    %169 = math.exp %168 : vector<8x128xf32>
    %cst_53 = arith.constant 1.000000e+00 : f32
    %170 = vector.broadcast %cst_53 : f32 to vector<8x128xf32>
    %171 = arith.addf %170, %169 : vector<8x128xf32>
    %172 = arith.divf %170, %171 : vector<8x128xf32>
    %173 = math.tanh %167 : vector<8x128xf32>
    %174 = vector.extract_strided_slice %172 {offsets = [0, 0], sizes = [8, 32], strides = [1, 1]} : vector<8x128xf32> to vector<8x32xf32>
    %175 = vector.extract_strided_slice %172 {offsets = [0, 32], sizes = [8, 32], strides = [1, 1]} : vector<8x128xf32> to vector<8x32xf32>
    %176 = vector.extract_strided_slice %173 {offsets = [0, 64], sizes = [8, 32], strides = [1, 1]} : vector<8x128xf32> to vector<8x32xf32>
    %177 = vector.extract_strided_slice %172 {offsets = [0, 96], sizes = [8, 32], strides = [1, 1]} : vector<8x128xf32> to vector<8x32xf32>
    %178 = arith.mulf %175, %156 : vector<8x32xf32>
    %179 = arith.mulf %174, %176 : vector<8x32xf32>
    %180 = arith.addf %178, %179 : vector<8x32xf32>
    %181 = math.tanh %180 : vector<8x32xf32>
    %182 = arith.mulf %177, %181 : vector<8x32xf32>
    %183 = arith.select %164, %182, %155 : vector<8x32xi1>, vector<8x32xf32>
    %184 = arith.select %164, %180, %156 : vector<8x32xi1>, vector<8x32xf32>
    %c6_i32 = arith.constant 6 : i32
    %c8_i32_54 = arith.constant 8 : i32
    %185 = arith.muli %c6_i32, %c8_i32_54 : i32
    %186 = tpu.assume_multiple %185, 8 : i32
    %187 = arith.index_cast %186 : i32 to index
    %c0_55 = arith.constant 0 : index
    %188 = vector.load %arg11[%187, %c0_55] : memref<64x128xf32, #tpu.memory_space<vmem>>, vector<8x128xf32>
    %189 = arith.index_cast %186 : i32 to index
    %c0_56 = arith.constant 0 : index
    %190 = vector.load %arg12[%189, %c0_56] : memref<64x32xf32, #tpu.memory_space<vmem>>, vector<8x32xf32>
    %cst_57 = arith.constant 0.000000e+00 : f32
    %191 = vector.broadcast %cst_57 : f32 to vector<8x32xf32>
    %192 = arith.cmpf one, %190, %191 : vector<8x32xf32>
    %193 = arith.truncf %183 : vector<8x32xf32> to vector<8x32xbf16>
    %cst_58 = arith.constant dense<0.000000e+00> : vector<8x128xf32>
    %194 = tpu.matmul %193, %14, %cst_58 {dimension_numbers = #tpu.dot_dimension_numbers<[1], [0], [0], [1], [0, 0, 1, 1], [], []>} : vector<8x32xbf16>, vector<32x128xbf16>, vector<8x128xf32> -> vector<8x128xf32>
    %195 = arith.addf %188, %194 : vector<8x128xf32>
    %196 = arith.negf %195 : vector<8x128xf32>
    %197 = math.exp %196 : vector<8x128xf32>
    %cst_59 = arith.constant 1.000000e+00 : f32
    %198 = vector.broadcast %cst_59 : f32 to vector<8x128xf32>
    %199 = arith.addf %198, %197 : vector<8x128xf32>
    %200 = arith.divf %198, %199 : vector<8x128xf32>
    %201 = math.tanh %195 : vector<8x128xf32>
    %202 = vector.extract_strided_slice %200 {offsets = [0, 0], sizes = [8, 32], strides = [1, 1]} : vector<8x128xf32> to vector<8x32xf32>
    %203 = vector.extract_strided_slice %200 {offsets = [0, 32], sizes = [8, 32], strides = [1, 1]} : vector<8x128xf32> to vector<8x32xf32>
    %204 = vector.extract_strided_slice %201 {offsets = [0, 64], sizes = [8, 32], strides = [1, 1]} : vector<8x128xf32> to vector<8x32xf32>
    %205 = vector.extract_strided_slice %200 {offsets = [0, 96], sizes = [8, 32], strides = [1, 1]} : vector<8x128xf32> to vector<8x32xf32>
    %206 = arith.mulf %203, %184 : vector<8x32xf32>
    %207 = arith.mulf %202, %204 : vector<8x32xf32>
    %208 = arith.addf %206, %207 : vector<8x32xf32>
    %209 = math.tanh %208 : vector<8x32xf32>
    %210 = arith.mulf %205, %209 : vector<8x32xf32>
    %211 = arith.select %192, %210, %183 : vector<8x32xi1>, vector<8x32xf32>
    %212 = arith.select %192, %208, %184 : vector<8x32xi1>, vector<8x32xf32>
    %c7_i32 = arith.constant 7 : i32
    %c8_i32_60 = arith.constant 8 : i32
    %213 = arith.muli %c7_i32, %c8_i32_60 : i32
    %214 = tpu.assume_multiple %213, 8 : i32
    %215 = arith.index_cast %214 : i32 to index
    %c0_61 = arith.constant 0 : index
    %216 = vector.load %arg11[%215, %c0_61] : memref<64x128xf32, #tpu.memory_space<vmem>>, vector<8x128xf32>
    %217 = arith.index_cast %214 : i32 to index
    %c0_62 = arith.constant 0 : index
    %218 = vector.load %arg12[%217, %c0_62] : memref<64x32xf32, #tpu.memory_space<vmem>>, vector<8x32xf32>
    %cst_63 = arith.constant 0.000000e+00 : f32
    %219 = vector.broadcast %cst_63 : f32 to vector<8x32xf32>
    %220 = arith.cmpf one, %218, %219 : vector<8x32xf32>
    %221 = arith.truncf %211 : vector<8x32xf32> to vector<8x32xbf16>
    %cst_64 = arith.constant dense<0.000000e+00> : vector<8x128xf32>
    %222 = tpu.matmul %221, %14, %cst_64 {dimension_numbers = #tpu.dot_dimension_numbers<[1], [0], [0], [1], [0, 0, 1, 1], [], []>} : vector<8x32xbf16>, vector<32x128xbf16>, vector<8x128xf32> -> vector<8x128xf32>
    %223 = arith.addf %216, %222 : vector<8x128xf32>
    %224 = arith.negf %223 : vector<8x128xf32>
    %225 = math.exp %224 : vector<8x128xf32>
    %cst_65 = arith.constant 1.000000e+00 : f32
    %226 = vector.broadcast %cst_65 : f32 to vector<8x128xf32>
    %227 = arith.addf %226, %225 : vector<8x128xf32>
    %228 = arith.divf %226, %227 : vector<8x128xf32>
    %229 = math.tanh %223 : vector<8x128xf32>
    %230 = vector.extract_strided_slice %228 {offsets = [0, 0], sizes = [8, 32], strides = [1, 1]} : vector<8x128xf32> to vector<8x32xf32>
    %231 = vector.extract_strided_slice %228 {offsets = [0, 32], sizes = [8, 32], strides = [1, 1]} : vector<8x128xf32> to vector<8x32xf32>
    %232 = vector.extract_strided_slice %229 {offsets = [0, 64], sizes = [8, 32], strides = [1, 1]} : vector<8x128xf32> to vector<8x32xf32>
    %233 = vector.extract_strided_slice %228 {offsets = [0, 96], sizes = [8, 32], strides = [1, 1]} : vector<8x128xf32> to vector<8x32xf32>
    %234 = arith.mulf %231, %212 : vector<8x32xf32>
    %235 = arith.mulf %230, %232 : vector<8x32xf32>
    %236 = arith.addf %234, %235 : vector<8x32xf32>
    %237 = math.tanh %236 : vector<8x32xf32>
    %238 = arith.mulf %233, %237 : vector<8x32xf32>
    %239 = arith.select %220, %238, %211 : vector<8x32xi1>, vector<8x32xf32>
    %240 = arith.select %220, %236, %212 : vector<8x32xi1>, vector<8x32xf32>
    %c8_i32_66 = arith.constant 8 : i32
    %c0_67 = arith.constant 0 : index
    %c0_68 = arith.constant 0 : index
    %241 = vector.load %arg9[%c0_67, %c0_68] : memref<8x32xf32, #tpu.memory_space<vmem>>, vector<8x32xf32>
    tpu.vector_store %arg9[%c0_67, %c0_68], %239 {strides = array<i32>} : memref<8x32xf32, #tpu.memory_space<vmem>>, vector<8x32xf32>,
    %c0_69 = arith.constant 0 : index
    %c0_70 = arith.constant 0 : index
    %242 = vector.load %arg10[%c0_69, %c0_70] : memref<8x32xf32, #tpu.memory_space<vmem>>, vector<8x32xf32>
    tpu.vector_store %arg10[%c0_69, %c0_70], %240 {strides = array<i32>} : memref<8x32xf32, #tpu.memory_space<vmem>>, vector<8x32xf32>,
    %c0_i32_71 = arith.constant 0 : i32
    %243 = arith.cmpi eq, %arg0, %c0_i32_71 : i32
    %244 = arith.extui %243 : i1 to i32
    %c0_i32_72 = arith.constant 0 : i32
    %245 = arith.cmpi ne, %244, %c0_i32_72 : i32
    scf.if %245 {
      %c0_73 = arith.constant 0 : index
      %c0_74 = arith.constant 0 : index
      %246 = vector.load %arg6[%c0_73, %c0_74] : memref<32x128xf32, #tpu.memory_space<vmem>>, vector<32x128xf32>
      %cst_75 = arith.constant dense<0.000000e+00> : vector<8x128xf32>
      %247 = tpu.matmul %239, %246, %cst_75 {dimension_numbers = #tpu.dot_dimension_numbers<[1], [0], [0], [1], [0, 0, 1, 1], [], []>} : vector<8x32xf32>, vector<32x128xf32>, vector<8x128xf32> -> vector<8x128xf32>
      %c0_76 = arith.constant 0 : index
      %c0_77 = arith.constant 0 : index
      %248 = vector.load %arg7[%c0_76, %c0_77] : memref<1x128xf32, #tpu.memory_space<vmem>>, vector<1x128xf32>
      %249 = vector.broadcast %248 : vector<1x128xf32> to vector<8x128xf32>
      %250 = arith.addf %247, %249 : vector<8x128xf32>
      %cst_78 = arith.constant 0.000000e+00 : f32
      %251 = vector.broadcast %cst_78 : f32 to vector<8x128xf32>
      %252 = arith.maximumf %250, %251 : vector<8x128xf32>
      %c0_79 = arith.constant 0 : index
      %c0_80 = arith.constant 0 : index
      %253 = vector.load %arg8[%c0_79, %c0_80] : memref<8x128xf32, #tpu.memory_space<vmem>>, vector<8x128xf32>
      tpu.vector_store %arg8[%c0_79, %c0_80], %252 {strides = array<i32>} : memref<8x128xf32, #tpu.memory_space<vmem>>, vector<8x128xf32>,
    } else {
    }
    return
  }
  func.func @transform_0(%arg0: i32) -> (i32, i32) {
    %c0_i32 = arith.constant 0 : i32
    %c0_i32_0 = arith.constant 0 : i32
    return %arg0, %c0_i32 : i32, i32
  }
  func.func @transform_1(%arg0: i32) -> (i32, i32) {
    %c0_i32 = arith.constant 0 : i32
    %c0_i32_0 = arith.constant 0 : i32
    return %arg0, %c0_i32 : i32, i32
  }
  func.func @transform_2(%arg0: i32) -> (i32, i32) {
    %c0_i32 = arith.constant 0 : i32
    %c0_i32_0 = arith.constant 0 : i32
    %c0_i32_1 = arith.constant 0 : i32
    return %c0_i32, %c0_i32_0 : i32, i32
  }
  func.func @transform_3(%arg0: i32) -> (i32, i32) {
    %c0_i32 = arith.constant 0 : i32
    %c0_i32_0 = arith.constant 0 : i32
    %c0_i32_1 = arith.constant 0 : i32
    return %c0_i32, %c0_i32_0 : i32, i32
  }
  func.func @transform_4(%arg0: i32) -> (i32, i32) {
    %c0_i32 = arith.constant 0 : i32
    %c0_i32_0 = arith.constant 0 : i32
    %c0_i32_1 = arith.constant 0 : i32
    return %c0_i32, %c0_i32_0 : i32, i32
  }
  func.func @transform_5(%arg0: i32) -> (i32, i32) {
    %c0_i32 = arith.constant 0 : i32
    %c0_i32_0 = arith.constant 0 : i32
    %c0_i32_1 = arith.constant 0 : i32
    return %c0_i32, %c0_i32_0 : i32, i32
  }
  func.func @transform_6(%arg0: i32) -> (i32, i32) {
    %c0_i32 = arith.constant 0 : i32
    %c0_i32_0 = arith.constant 0 : i32
    %c0_i32_1 = arith.constant 0 : i32
    return %c0_i32, %c0_i32_0 : i32, i32
  }
  func.func @transform_7(%arg0: i32) -> (i32, i32) {
    %c0_i32 = arith.constant 0 : i32
    %c0_i32_0 = arith.constant 0 : i32
    %c0_i32_1 = arith.constant 0 : i32
    return %c0_i32, %c0_i32_0 : i32, i32
  }
}

</mosaic_0001>

<bundles_post_ra>
// kernel: tpu_custom_call.1
= control target key start
LH: loop header
LB: loop body
LE: loop exit
PB: predicated region body
PF: predicated region fallthrough
CT: control target
= control target key end

     0   :  { %vm32_vm0 = vcmask 261120   ;;  %vm75_vm1 = vcmask 130048   ;;  %v1001_v3 = vmov 0.0   ;;  %s1225_s0 = inlined_call_operand.vmem [shape: bf16[64,16], index: 0, kind: input, shape index: {}]   ;;  %s1226_s1 = inlined_call_operand.vmem [shape: f32[64,1], index: 1, kind: input, shape index: {}]   ;;  %s1227_s2 = inlined_call_operand.vmem [shape: bf16[16,128], index: 2, kind: input, shape index: {}]   ;;  %s1228_s3 = inlined_call_operand.vmem [shape: bf16[32,128], index: 3, kind: input, shape index: {}]   ;;  %s1229_s4 = inlined_call_operand.vmem [shape: f32[1,128], index: 4, kind: input, shape index: {}]   ;;  %s1230_s5 = inlined_call_operand.vmem [shape: f32[32,128], index: 5, kind: input, shape index: {}]   ;;  %s1231_s6 = inlined_call_operand.vmem [shape: f32[1,128], index: 6, kind: input, shape index: {}]   ;;  %s1232_s7 = inlined_call_operand.hbm [shape: f32[8,128], index: 7, kind: output, shape index: {}]  }
   0x1   :  { %v897_v0 = vld [vmem:[%s1227_s2] sm:$0xff]  ;;  %v1053_v1 = vld [vmem:[%s1228_s3 + $0x8] sm:$0xff]  ;;  %33 = vst.msk [vmem:[#allocation2] sm:$0xff] %vm32_vm0, %v1001_v3 }
   0x2   :  { %v893_v2 = vld [vmem:[%s1225_s0] sm:$0xff]  ;;  %95 = vmatpush.bf16.msra.mxu0 %v897_v0  ;;  %213 = vmatpush.bf16.msra.mxu1 %v1053_v1  ;;  %34 = vst.msk [vmem:[#allocation3] sm:$0xff] %vm32_vm0, %v1001_v3 }
   0x3   :  { %v1063_v4 = vld [vmem:[%s1228_s3] sm:$0xff] }
   0x4   :  { %12 = vsyncpa [#allocation7], 0  ;;  %287 = vmatpush.bf16.msra.mxu2 %v1053_v1  ;;  %361 = vmatpush.bf16.msra.mxu3 %v1053_v1  ;;  %v1088_v7 = vld [vmem:[%s1229_s4] ss:$0 sm:$0xff]  ;;  %s1002_s9 = smov 64   ;;  %s1003_s10 = smov 32  }
   0x5   :  { %864 = vmatmul.msk.bf16.vlgmr.msra.gmra.mxu0 %vm75_vm1, %v893_v2  ;;  %v125_v30 = vld [vmem:[%s1226_s1] sm:$0xff]  ;;  %v1004_v31 = vmov 0   ;;  %s1005_s12 = smov 96   ;;  %v126_v43 = vld [vmem:[%s1226_s1 + $0x8] sm:$0xff]  ;;  %s835_s18 = sshll.u32 %s1232_s7, 4  ;;  %s836_s18 = int_to_ptr.hbm [resolvable:$true] %s835_s18 }
   0x6   :  { %214 = vmatpush.bf16.msra.mxu1 %v1063_v4  ;;  %906 = vset.pattern.permute.xlu2 %v1004_v31 }
   0x7   :  { %907 = vset.pattern.permute.xlu0 %v1004_v31  ;;  %135 = vperm.xlu2 %906, %v125_v30  }
   0x8   :  { %288 = vmatpush.bf16.msra.mxu2 %v1063_v4  ;;  %362 = vmatpush.bf16.msra.mxu3 %v1063_v4  ;;  %v1072_v5 = vld [vmem:[#allocation2] sm:$0xff] }
   0x9   :  { %v191_v6 = vpack.c.bf16 %v1072_v5, %v1072_v5  ;;  %v187_v14 = vld [vmem:[#allocation3] sm:$0xff]  ;;  %908 = vset.pattern.permute.xlu1 %v1004_v31 }
   0xa   :  { %435 = vmatpush.bf16.msrb.mxu1 %v1053_v1 }
   0xb   :  { %876 = vmatmul.msk.bf16.vlgmr.msra.gmra.mxu1 %vm32_vm0, %v191_v6 }
   0xc   :  { %509 = vmatpush.bf16.msrb.mxu2 %v1053_v1  ;;  %583 = vmatpush.bf16.msrb.mxu3 %v1053_v1 }
   0xe   :  { %436 = vmatpush.bf16.msrb.mxu1 %v1063_v4 }
  0x10   :  { %510 = vmatpush.bf16.msrb.mxu2 %v1063_v4  ;;  %584 = vmatpush.bf16.msrb.mxu3 %v1063_v4 }
  0x12   :  { %657 = vmatpush.bf16.msra.mxu1 %v1053_v1 }
  0x16   :  { %658 = vmatpush.bf16.msra.mxu1 %v1063_v4 }
  0x61   :  { %v136_v37 = vpop.permute.xlu2 %135 }
  0x62   :  { %174 = vst.msk [vmem:[#allocation5] sm:$0xff] %vm32_vm0, %v136_v37 }
  0x69   :  { %v189_v40 = vld [vmem:[#allocation5] sm:$0xff] }
  0x6a   :  { %vm190_vm6 = vcmp.ne.f32.partialorder %v189_v40, 0.0 }
  0x82   :  { %v97_v8 = vpop.f32.mrf.mxu0 }
  0x83   :  { %v98_v9 = vadd.f32 %v1088_v7, %v97_v8 }
  0x88   :  { %v216_v10 = vpop.f32.mrf.mxu1 }
  0x89   :  { %v220_v11 = vadd.f32 %v216_v10, %v98_v9 }
  0x8a   :  { %v99_v49 = vpop.f32.mrf.mxu0 }
  0x8b   :  { %911 = vtanh.f32 %v220_v11  ;;  %v877_v15 = vmul.f32 -1.442695, %v220_v11  ;;  %v100_v50 = vadd.f32 %v1088_v7, %v99_v49  ;;  %v894_v11 = vld [vmem:[%s1225_s0 + $0x8] sm:$0xff] }
  0x8c   :  { %865 = vmatmul.msk.bf16.gmra.mxu0 %vm75_vm1, %v894_v11 }
  0x8d   :  { %913 = vpow2.f32 %v877_v15 }
  0x90   :  { %v218_v12 = vpop.f32.mrf.mxu1 }
  0x91   :  { %v912_v13 = vpop.eup %911 }
  0x92   :  { %247 = vrot.lane.b32.xlu0 %v912_v13, %s1002_s9 }
  0x93   :  { %v914_v16 = vpop.eup %913 }
  0x94   :  { %v224_v17 = vadd.f32 1.0, %v914_v16 }
  0x96   :  { %915 = vrcp.f32 %v224_v17  ;;  %v236_v23 = vand.u32 2147483648, %v224_v17  ;;  %vm230_vm3 = vweird.f32 %v224_v17  ;;  %v234_v24 = vand.u32 2147483647, %v224_v17 }
  0x98   :  { %v237_v26 = vor.u32 1.1754944e-38, %v236_v23  ;;  %vm235_vm5 = vcmp.eq.f32.partialorder %v234_v24, 8.507059e+37 }
  0x9a   :  { %242 = vrot.lane.b32.xlu0 %v187_v14, %s1003_s10 }
  0x9c   :  { %v916_v18 = vpop.eup %915 }
  0x9d   :  { %v226_v19 = vmul.f32 %v916_v18, %v224_v17  ;;  %vm231_vm2 = vweird.f32 %v916_v18 }
  0x9e   :  { %vm232_vm4 = vmor %vm230_vm3, %vm231_vm2 }
  0x9f   :  { %v227_v20 = vsub.f32 1.0, %v226_v19 }
  0xa1   :  { %v228_v21 = vmul.f32 %v916_v18, %v227_v20 }
  0xa3   :  { %v229_v22 = vadd.f32 %v916_v18, %v228_v21 }
  0xa5   :  { %v233_v25 = vsel %vm232_vm4, %v916_v18, %v229_v22 }
  0xa6   :  { %v238_v28 = vsel %vm235_vm5, %v237_v26, %v233_v25 }
 0x104   :  { %v248_v27 = vpop.permute.xlu0 %247 }
 0x105   :  { %v250_v29 = vmul.f32 %v248_v27, %v238_v28 }
 0x107   :  { %252 = vrot.lane.b32.xlu1 %v250_v29, %s1003_s10  ;;  %v127_v29 = vld [vmem:[%s1226_s1 + $0x10] sm:$0xff] }
 0x109   :  { %v102_v20 = vpop.f32.mrf.mxu0 }
 0x10a   :  { %v103_v21 = vadd.f32 %v1088_v7, %v102_v20 }
 0x10c   :  { %v243_v32 = vpop.permute.xlu0 %242 }
 0x10d   :  { %v245_v33 = vmul.f32 %v243_v32, %v238_v28 }
 0x179   :  { %v253_v34 = vpop.permute.xlu1 %252 }
 0x17a   :  { %v255_v35 = vadd.f32 %v253_v34, %v245_v33 }
 0x17c   :  { %917 = vtanh.f32 %v255_v35  ;;  %268 = vrot.lane.b32.xlu0 %v255_v35, %s1005_s12 }
 0x182   :  { %v918_v36 = vpop.eup %917 }
 0x183   :  { %258 = vrot.lane.b32.xlu1 %v918_v36, %s1002_s9 }
 0x1ee   :  { %v269_v41 = vpop.permute.xlu0 %268 }
 0x1ef   :  { %v271_v42 = vsel %vm190_vm6, %v269_v41, %v187_v14 }
 0x1f5   :  { %v259_v38 = vpop.permute.xlu1 %258 }
 0x1f6   :  { %v261_v39 = vmul.f32 %v259_v38, %v238_v28 }
 0x1f8   :  { %263 = vrot.lane.b32.xlu2 %v261_v39, %s1003_s10 }
 0x200   :  { %316 = vrot.lane.b32.xlu2 %v271_v42, %s1003_s10 }
 0x208   :  { %140 = vperm.xlu2 %906, %v126_v43  }
 0x252   :  { %v264_v44 = vpop.permute.xlu2 %263 }
 0x253   :  { %v266_v45 = vsel %vm190_vm6, %v264_v44, %v1072_v5 }
 0x254   :  { %v277_v46 = vpack.c.bf16 %v266_v45, %v266_v45 }
 0x256   :  { %878 = vmatmul.msk.bf16.vlgmr.msra.gmra.mxu2 %vm32_vm0, %v277_v46 }
 0x257   :  { %731 = vmatpush.bf16.msra.mxu2 %v1053_v1 }
 0x25a   :  { %v317_v47 = vpop.permute.xlu2 %316 }
 0x25b   :  { %732 = vmatpush.bf16.msra.mxu2 %v1063_v4 }
 0x262   :  { %v141_v48 = vpop.permute.xlu2 %140 }
 0x263   :  { %175 = vst.msk [vmem:[#allocation5 + $0x8] sm:$0xff] %vm32_vm0, %v141_v48 }
 0x26a   :  { %v275_v14 = vld [vmem:[#allocation5 + $0x8] sm:$0xff] }
 0x26b   :  { %vm276_vm11 = vcmp.ne.f32.partialorder %v275_v14, 0.0 }
 0x2d9   :  { %v290_v51 = vpop.f32.mrf.mxu2 }
 0x2da   :  { %v294_v52 = vadd.f32 %v290_v51, %v100_v50 }
 0x2dc   :  { %919 = vtanh.f32 %v294_v52  ;;  %v879_v55 = vmul.f32 -1.442695, %v294_v52 }
 0x2de   :  { %921 = vpow2.f32 %v879_v55 }
 0x2e1   :  { %v292_v53 = vpop.f32.mrf.mxu2 }
 0x2e2   :  { %v920_v54 = vpop.eup %919  ;;  %v128_v53 = vld [vmem:[%s1226_s1 + $0x18] sm:$0xff] }
 0x2e3   :  { %321 = vrot.lane.b32.xlu1 %v920_v54, %s1002_s9 }
 0x2e4   :  { %v922_v56 = vpop.eup %921 }
 0x2e5   :  { %v298_v57 = vadd.f32 1.0, %v922_v56 }
 0x2e7   :  { %923 = vrcp.f32 %v298_v57  ;;  %v310_v63 = vand.u32 2147483648, %v298_v57  ;;  %vm304_vm8 = vweird.f32 %v298_v57  ;;  %v308_v0 = vand.u32 2147483647, %v298_v57 }
 0x2e9   :  { %v311_v2 = vor.u32 1.1754944e-38, %v310_v63  ;;  %vm309_vm10 = vcmp.eq.f32.partialorder %v308_v0, 8.507059e+37 }
 0x2ed   :  { %v924_v58 = vpop.eup %923 }
 0x2ee   :  { %v300_v59 = vmul.f32 %v924_v58, %v298_v57  ;;  %vm305_vm7 = vweird.f32 %v924_v58 }
 0x2ef   :  { %vm306_vm9 = vmor %vm304_vm8, %vm305_vm7 }
 0x2f0   :  { %v301_v60 = vsub.f32 1.0, %v300_v59  ;;  %v104_v59 = vpop.f32.mrf.mxu0 }
 0x2f2   :  { %v302_v61 = vmul.f32 %v924_v58, %v301_v60  ;;  %v105_v60 = vadd.f32 %v1088_v7, %v104_v59 }
 0x2f4   :  { %v303_v62 = vadd.f32 %v924_v58, %v302_v61 }
 0x2f6   :  { %v307_v1 = vsel %vm306_vm9, %v924_v58, %v303_v62 }
 0x2f7   :  { %v312_v4 = vsel %vm309_vm10, %v311_v2, %v307_v1 }
 0x2f8   :  { %v319_v6 = vmul.f32 %v317_v47, %v312_v4 }
 0x355   :  { %v322_v3 = vpop.permute.xlu1 %321 }
 0x356   :  { %v324_v5 = vmul.f32 %v322_v3, %v312_v4 }
 0x358   :  { %326 = vrot.lane.b32.xlu0 %v324_v5, %s1003_s10 }
 0x3ca   :  { %v327_v8 = vpop.permute.xlu0 %326 }
 0x3cb   :  { %v329_v9 = vadd.f32 %v327_v8, %v319_v6 }
 0x3cd   :  { %925 = vtanh.f32 %v329_v9 }
 0x3d3   :  { %v926_v10 = vpop.eup %925 }
 0x3d4   :  { %332 = vrot.lane.b32.xlu1 %v926_v10, %s1002_s9 }
 0x3dc   :  { %342 = vrot.lane.b32.xlu1 %v329_v9, %s1005_s12 }
 0x446   :  { %v333_v12 = vpop.permute.xlu1 %332 }
 0x447   :  { %v335_v13 = vmul.f32 %v333_v12, %v312_v4 }
 0x449   :  { %337 = vrot.lane.b32.xlu0 %v335_v13, %s1003_s10 }
 0x44e   :  { %v343_v15 = vpop.permute.xlu1 %342 }
 0x44f   :  { %v345_v16 = vsel %vm276_vm11, %v343_v15, %v271_v42 }
 0x451   :  { %390 = vrot.lane.b32.xlu0 %v345_v16, %s1003_s10 }
 0x459   :  { %145 = vperm.xlu0 %907, %v127_v29  }
 0x4bb   :  { %v338_v17 = vpop.permute.xlu0 %337 }
 0x4bc   :  { %v340_v18 = vsel %vm276_vm11, %v338_v17, %v266_v45 }
 0x4bd   :  { %v351_v19 = vpack.c.bf16 %v340_v18, %v340_v18 }
 0x4bf   :  { %880 = vmatmul.msk.bf16.vlgmr.msra.gmra.mxu3 %vm32_vm0, %v351_v19 }
 0x4c3   :  { %v391_v42 = vpop.permute.xlu0 %390 }
 0x4cb   :  { %v146_v43 = vpop.permute.xlu0 %145 }
 0x4cc   :  { %176 = vst.msk [vmem:[#allocation5 + $0x10] sm:$0xff] %vm32_vm0, %v146_v43 }
 0x4d3   :  { %v349_v50 = vld [vmem:[#allocation5 + $0x10] sm:$0xff] }
 0x4d4   :  { %vm350_vm2 = vcmp.ne.f32.partialorder %v349_v50, 0.0 }
 0x542   :  { %v364_v22 = vpop.f32.mrf.mxu3 }
 0x543   :  { %v368_v23 = vadd.f32 %v364_v22, %v103_v21  ;;  %v895_v21 = vld [vmem:[%s1225_s0 + $0x10] sm:$0xff] }
 0x544   :  { %866 = vmatmul.msk.bf16.gmra.mxu0 %vm75_vm1, %v895_v21 }
 0x545   :  { %927 = vtanh.f32 %v368_v23  ;;  %v881_v26 = vmul.f32 -1.442695, %v368_v23 }
 0x547   :  { %929 = vpow2.f32 %v881_v26 }
 0x54a   :  { %v366_v24 = vpop.f32.mrf.mxu3 }
 0x54b   :  { %v928_v25 = vpop.eup %927 }
 0x54c   :  { %395 = vrot.lane.b32.xlu2 %v928_v25, %s1002_s9 }
 0x54d   :  { %v930_v27 = vpop.eup %929 }
 0x54e   :  { %v372_v28 = vadd.f32 1.0, %v930_v27  ;;  %v129_v27 = vld [vmem:[%s1226_s1 + $0x20] sm:$0xff] }
 0x550   :  { %931 = vrcp.f32 %v372_v28  ;;  %v384_v35 = vand.u32 2147483648, %v372_v28  ;;  %vm378_vm13 = vweird.f32 %v372_v28  ;;  %v382_v36 = vand.u32 2147483647, %v372_v28 }
 0x552   :  { %v385_v38 = vor.u32 1.1754944e-38, %v384_v35  ;;  %vm383_vm15 = vcmp.eq.f32.partialorder %v382_v36, 8.507059e+37 }
 0x556   :  { %v932_v30 = vpop.eup %931 }
 0x557   :  { %v374_v31 = vmul.f32 %v932_v30, %v372_v28  ;;  %vm379_vm12 = vweird.f32 %v932_v30 }
 0x558   :  { %vm380_vm14 = vmor %vm378_vm13, %vm379_vm12 }
 0x559   :  { %v375_v32 = vsub.f32 1.0, %v374_v31 }
 0x55b   :  { %v376_v33 = vmul.f32 %v932_v30, %v375_v32 }
 0x55d   :  { %v377_v34 = vadd.f32 %v932_v30, %v376_v33 }
 0x55f   :  { %v381_v37 = vsel %vm380_vm14, %v932_v30, %v377_v34 }
 0x560   :  { %v386_v40 = vsel %vm383_vm15, %v385_v38, %v381_v37 }
 0x561   :  { %v393_v44 = vmul.f32 %v391_v42, %v386_v40 }
 0x5a6   :  { %v396_v39 = vpop.permute.xlu2 %395 }
 0x5a7   :  { %v398_v41 = vmul.f32 %v396_v39, %v386_v40 }
 0x5a9   :  { %400 = vrot.lane.b32.xlu1 %v398_v41, %s1003_s10 }
 0x5c1   :  { %v107_v33 = vpop.f32.mrf.mxu0 }
 0x5c2   :  { %v108_v34 = vadd.f32 %v1088_v7, %v107_v33 }
 0x61b   :  { %v401_v45 = vpop.permute.xlu1 %400 }
 0x61c   :  { %v403_v46 = vadd.f32 %v401_v45, %v393_v44 }
 0x61e   :  { %933 = vtanh.f32 %v403_v46 }
 0x624   :  { %v934_v47 = vpop.eup %933 }
 0x625   :  { %406 = vrot.lane.b32.xlu2 %v934_v47, %s1002_s9 }
 0x62d   :  { %416 = vrot.lane.b32.xlu2 %v403_v46, %s1005_s12 }
 0x67f   :  { %v407_v48 = vpop.permute.xlu2 %406 }
 0x680   :  { %v409_v49 = vmul.f32 %v407_v48, %v386_v40 }
 0x682   :  { %411 = vrot.lane.b32.xlu1 %v409_v49, %s1003_s10 }
 0x687   :  { %v417_v51 = vpop.permute.xlu2 %416 }
 0x688   :  { %v419_v52 = vsel %vm350_vm2, %v417_v51, %v345_v16 }
 0x689   :  { %464 = vrot.lane.b32.xlu2 %v419_v52, %s1003_s10 }
 0x691   :  { %150 = vperm.xlu2 %906, %v128_v53  }
 0x6e3   :  { %v465_v54 = vpop.permute.xlu2 %464 }
 0x6eb   :  { %v151_v55 = vpop.permute.xlu2 %150 }
 0x6ec   :  { %177 = vst.msk [vmem:[#allocation5 + $0x18] sm:$0xff] %vm32_vm0, %v151_v55 }
 0x6f3   :  { %v423_v24 = vld [vmem:[#allocation5 + $0x18] sm:$0xff] }
 0x6f4   :  { %v412_v56 = vpop.permute.xlu1 %411  ;;  %vm424_vm7 = vcmp.ne.f32.partialorder %v423_v24, 0.0  ;;  %v130_v24 = vld [vmem:[%s1226_s1 + $0x28] sm:$0xff] }
 0x6f5   :  { %v414_v57 = vsel %vm350_vm2, %v412_v56, %v340_v18 }
 0x6f6   :  { %v425_v58 = vpack.c.bf16 %v414_v57, %v414_v57 }
 0x6f8   :  { %882 = vmatmul.msk.bf16.vlgmr.msrb.gmra.mxu1 %vm32_vm0, %v425_v58 }
 0x775   :  { %v438_v61 = vpop.f32.mrf.mxu1 }
 0x776   :  { %v442_v62 = vadd.f32 %v438_v61, %v105_v60 }
 0x778   :  { %935 = vtanh.f32 %v442_v62  ;;  %v883_v1 = vmul.f32 -1.442695, %v442_v62 }
 0x77a   :  { %937 = vpow2.f32 %v883_v1 }
 0x77d   :  { %v440_v63 = vpop.f32.mrf.mxu1 }
 0x77e   :  { %v936_v0 = vpop.eup %935 }
 0x77f   :  { %469 = vrot.lane.b32.xlu1 %v936_v0, %s1002_s9 }
 0x780   :  { %v938_v2 = vpop.eup %937 }
 0x781   :  { %v446_v3 = vadd.f32 1.0, %v938_v2  ;;  %v109_v2 = vpop.f32.mrf.mxu0 }
 0x783   :  { %939 = vrcp.f32 %v446_v3  ;;  %v458_v10 = vand.u32 2147483648, %v446_v3  ;;  %vm452_vm4 = vweird.f32 %v446_v3  ;;  %v456_v11 = vand.u32 2147483647, %v446_v3 }
 0x785   :  { %v459_v13 = vor.u32 1.1754944e-38, %v458_v10  ;;  %vm457_vm6 = vcmp.eq.f32.partialorder %v456_v11, 8.507059e+37 }
 0x789   :  { %v940_v4 = vpop.eup %939 }
 0x78a   :  { %v448_v5 = vmul.f32 %v940_v4, %v446_v3  ;;  %vm453_vm3 = vweird.f32 %v940_v4  ;;  %v110_v3 = vadd.f32 %v1088_v7, %v109_v2 }
 0x78b   :  { %vm454_vm5 = vmor %vm452_vm4, %vm453_vm3 }
 0x78c   :  { %v449_v6 = vsub.f32 1.0, %v448_v5 }
 0x78e   :  { %v450_v8 = vmul.f32 %v940_v4, %v449_v6 }
 0x790   :  { %v451_v9 = vadd.f32 %v940_v4, %v450_v8 }
 0x792   :  { %v455_v12 = vsel %vm454_vm5, %v940_v4, %v451_v9 }
 0x793   :  { %v460_v15 = vsel %vm457_vm6, %v459_v13, %v455_v12 }
 0x794   :  { %v467_v17 = vmul.f32 %v465_v54, %v460_v15 }
 0x7f1   :  { %v470_v14 = vpop.permute.xlu1 %469 }
 0x7f2   :  { %v472_v16 = vmul.f32 %v470_v14, %v460_v15 }
 0x7f4   :  { %474 = vrot.lane.b32.xlu0 %v472_v16, %s1003_s10 }
 0x866   :  { %v475_v18 = vpop.permute.xlu0 %474 }
 0x867   :  { %v477_v19 = vadd.f32 %v475_v18, %v467_v17 }
 0x869   :  { %941 = vtanh.f32 %v477_v19 }
 0x86f   :  { %v942_v20 = vpop.eup %941 }
 0x870   :  { %480 = vrot.lane.b32.xlu1 %v942_v20, %s1002_s9 }
 0x878   :  { %490 = vrot.lane.b32.xlu1 %v477_v19, %s1005_s12 }
 0x8e2   :  { %v481_v22 = vpop.permute.xlu1 %480 }
 0x8e3   :  { %v483_v23 = vmul.f32 %v481_v22, %v460_v15 }
 0x8e5   :  { %485 = vrot.lane.b32.xlu0 %v483_v23, %s1003_s10 }
 0x8ea   :  { %v491_v25 = vpop.permute.xlu1 %490 }
 0x8eb   :  { %v493_v26 = vsel %vm424_vm7, %v491_v25, %v419_v52 }
 0x8ed   :  { %538 = vrot.lane.b32.xlu0 %v493_v26, %s1003_s10 }
 0x8f5   :  { %155 = vperm.xlu0 %907, %v129_v27  }
 0x957   :  { %v486_v28 = vpop.permute.xlu0 %485 }
 0x958   :  { %v488_v29 = vsel %vm424_vm7, %v486_v28, %v414_v57 }
 0x959   :  { %v499_v30 = vpack.c.bf16 %v488_v29, %v488_v29 }
 0x95b   :  { %884 = vmatmul.msk.bf16.vlgmr.msrb.gmra.mxu2 %vm32_vm0, %v499_v30 }
 0x95f   :  { %v539_v31 = vpop.permute.xlu0 %538 }
 0x967   :  { %v156_v32 = vpop.permute.xlu0 %155 }
 0x968   :  { %178 = vst.msk [vmem:[#allocation5 + $0x20] sm:$0xff] %vm32_vm0, %v156_v32 }
 0x96f   :  { %v497_v60 = vld [vmem:[#allocation5 + $0x20] sm:$0xff] }
 0x970   :  { %vm498_vm12 = vcmp.ne.f32.partialorder %v497_v60, 0.0 }
 0x9de   :  { %v512_v35 = vpop.f32.mrf.mxu2 }
 0x9df   :  { %v516_v36 = vadd.f32 %v512_v35, %v108_v34 }
 0x9e1   :  { %943 = vtanh.f32 %v516_v36  ;;  %v885_v39 = vmul.f32 -1.442695, %v516_v36 }
 0x9e3   :  { %945 = vpow2.f32 %v885_v39 }
 0x9e6   :  { %v514_v37 = vpop.f32.mrf.mxu2 }
 0x9e7   :  { %v944_v38 = vpop.eup %943  ;;  %v131_v37 = vld [vmem:[%s1226_s1 + $0x30] sm:$0xff] }
 0x9e8   :  { %543 = vrot.lane.b32.xlu2 %v944_v38, %s1002_s9 }
 0x9e9   :  { %v946_v40 = vpop.eup %945 }
 0x9ea   :  { %v520_v41 = vadd.f32 1.0, %v946_v40 }
 0x9ec   :  { %947 = vrcp.f32 %v520_v41  ;;  %v532_v47 = vand.u32 2147483648, %v520_v41  ;;  %vm526_vm9 = vweird.f32 %v520_v41  ;;  %v530_v48 = vand.u32 2147483647, %v520_v41 }
 0x9ee   :  { %v533_v50 = vor.u32 1.1754944e-38, %v532_v47  ;;  %vm531_vm11 = vcmp.eq.f32.partialorder %v530_v48, 8.507059e+37 }
 0x9f2   :  { %v948_v42 = vpop.eup %947 }
 0x9f3   :  { %v522_v43 = vmul.f32 %v948_v42, %v520_v41  ;;  %vm527_vm8 = vweird.f32 %v948_v42 }
 0x9f4   :  { %vm528_vm10 = vmor %vm526_vm9, %vm527_vm8 }
 0x9f5   :  { %v523_v44 = vsub.f32 1.0, %v522_v43 }
 0x9f7   :  { %v524_v45 = vmul.f32 %v948_v42, %v523_v44 }
 0x9f9   :  { %v525_v46 = vadd.f32 %v948_v42, %v524_v45 }
 0x9fb   :  { %v529_v49 = vsel %vm528_vm10, %v948_v42, %v525_v46 }
 0x9fc   :  { %v534_v52 = vsel %vm531_vm11, %v533_v50, %v529_v49 }
 0x9fd   :  { %v541_v54 = vmul.f32 %v539_v31, %v534_v52  ;;  %v896_v31 = vld [vmem:[%s1225_s0 + $0x18] sm:$0xff] }
 0x9fe   :  { %867 = vmatmul.msk.bf16.gmra.mxu0 %vm75_vm1, %v896_v31 }
 0xa42   :  { %v544_v51 = vpop.permute.xlu2 %543 }
 0xa43   :  { %v546_v53 = vmul.f32 %v544_v51, %v534_v52 }
 0xa45   :  { %548 = vrot.lane.b32.xlu1 %v546_v53, %s1003_s10 }
 0xa7b   :  { %v112_v43 = vpop.f32.mrf.mxu0 }
 0xa7c   :  { %v113_v44 = vadd.f32 %v1088_v7, %v112_v43  ;;  %v795_v43 = vld [vmem:[%s1230_s5] sm:$0xff] }
 0xab7   :  { %v549_v55 = vpop.permute.xlu1 %548 }
 0xab8   :  { %v551_v56 = vadd.f32 %v549_v55, %v541_v54 }
 0xaba   :  { %949 = vtanh.f32 %v551_v56 }
 0xac0   :  { %v950_v57 = vpop.eup %949 }
 0xac1   :  { %554 = vrot.lane.b32.xlu2 %v950_v57, %s1002_s9 }
 0xac9   :  { %564 = vrot.lane.b32.xlu2 %v551_v56, %s1005_s12 }
 0xb1b   :  { %v555_v58 = vpop.permute.xlu2 %554 }
 0xb1c   :  { %v557_v59 = vmul.f32 %v555_v58, %v534_v52 }
 0xb1e   :  { %559 = vrot.lane.b32.xlu1 %v557_v59, %s1003_s10 }
 0xb23   :  { %v565_v61 = vpop.permute.xlu2 %564 }
 0xb24   :  { %v567_v62 = vsel %vm498_vm12, %v565_v61, %v493_v26 }
 0xb26   :  { %612 = vrot.lane.b32.xlu1 %v567_v62, %s1003_s10 }
 0xb2e   :  { %160 = vperm.xlu1 %908, %v130_v24  }
 0xb90   :  { %v560_v63 = vpop.permute.xlu1 %559 }
 0xb91   :  { %v562_v0 = vsel %vm498_vm12, %v560_v63, %v488_v29 }
 0xb92   :  { %v573_v1 = vpack.c.bf16 %v562_v0, %v562_v0 }
 0xb94   :  { %886 = vmatmul.msk.bf16.vlgmr.msrb.gmra.mxu3 %vm32_vm0, %v573_v1 }
 0xb98   :  { %v613_v25 = vpop.permute.xlu1 %612 }
 0xba0   :  { %v161_v30 = vpop.permute.xlu1 %160 }
 0xba1   :  { %179 = vst.msk [vmem:[#allocation5 + $0x28] sm:$0xff] %vm32_vm0, %v161_v30 }
 0xba8   :  { %v571_v34 = vld [vmem:[#allocation5 + $0x28] sm:$0xff] }
 0xba9   :  { %vm572_vm3 = vcmp.ne.f32.partialorder %v571_v34, 0.0 }
 0xc17   :  { %v586_v4 = vpop.f32.mrf.mxu3 }
 0xc18   :  { %v590_v5 = vadd.f32 %v586_v4, %v110_v3 }
 0xc1a   :  { %951 = vtanh.f32 %v590_v5  ;;  %v887_v9 = vmul.f32 -1.442695, %v590_v5 }
 0xc1c   :  { %953 = vpow2.f32 %v887_v9 }
 0xc1f   :  { %v588_v6 = vpop.f32.mrf.mxu3 }
 0xc20   :  { %v952_v8 = vpop.eup %951 }
 0xc21   :  { %617 = vrot.lane.b32.xlu0 %v952_v8, %s1002_s9 }
 0xc22   :  { %v954_v10 = vpop.eup %953 }
 0xc23   :  { %v594_v11 = vadd.f32 1.0, %v954_v10  ;;  %v132_v10 = vld [vmem:[%s1226_s1 + $0x38] sm:$0xff] }
 0xc25   :  { %955 = vrcp.f32 %v594_v11  ;;  %v606_v17 = vand.u32 2147483648, %v594_v11  ;;  %vm600_vm14 = vweird.f32 %v594_v11  ;;  %v604_v18 = vand.u32 2147483647, %v594_v11 }
 0xc27   :  { %v607_v20 = vor.u32 1.1754944e-38, %v606_v17  ;;  %vm605_vm2 = vcmp.eq.f32.partialorder %v604_v18, 8.507059e+37 }
 0xc2b   :  { %v956_v12 = vpop.eup %955 }
 0xc2c   :  { %v596_v13 = vmul.f32 %v956_v12, %v594_v11  ;;  %vm601_vm13 = vweird.f32 %v956_v12 }
 0xc2d   :  { %vm602_vm15 = vmor %vm600_vm14, %vm601_vm13 }
 0xc2e   :  { %v597_v14 = vsub.f32 1.0, %v596_v13 }
 0xc30   :  { %v598_v15 = vmul.f32 %v956_v12, %v597_v14 }
 0xc32   :  { %v599_v16 = vadd.f32 %v956_v12, %v598_v15 }
 0xc34   :  { %v603_v19 = vsel %vm602_vm15, %v956_v12, %v599_v16  ;;  %v114_v16 = vpop.f32.mrf.mxu0 }
 0xc35   :  { %v608_v22 = vsel %vm605_vm2, %v607_v20, %v603_v19  ;;  %v115_v17 = vadd.f32 %v1088_v7, %v114_v16 }
 0xc36   :  { %v615_v26 = vmul.f32 %v613_v25, %v608_v22 }
 0xc93   :  { %v618_v21 = vpop.permute.xlu0 %617 }
 0xc94   :  { %v620_v23 = vmul.f32 %v618_v21, %v608_v22 }
 0xc96   :  { %622 = vrot.lane.b32.xlu2 %v620_v23, %s1003_s10 }
 0xcf0   :  { %v623_v27 = vpop.permute.xlu2 %622 }
 0xcf1   :  { %v625_v28 = vadd.f32 %v623_v27, %v615_v26 }
 0xcf3   :  { %957 = vtanh.f32 %v625_v28 }
 0xcf9   :  { %v958_v29 = vpop.eup %957 }
 0xcfa   :  { %628 = vrot.lane.b32.xlu0 %v958_v29, %s1002_s9 }
 0xd02   :  { %638 = vrot.lane.b32.xlu0 %v625_v28, %s1005_s12 }
 0xd6c   :  { %v629_v32 = vpop.permute.xlu0 %628 }
 0xd6d   :  { %v631_v33 = vmul.f32 %v629_v32, %v608_v22 }
 0xd6f   :  { %633 = vrot.lane.b32.xlu2 %v631_v33, %s1003_s10 }
 0xd74   :  { %v639_v35 = vpop.permute.xlu0 %638 }
 0xd75   :  { %v641_v36 = vsel %vm572_vm3, %v639_v35, %v567_v62 }
 0xd77   :  { %686 = vrot.lane.b32.xlu2 %v641_v36, %s1003_s10 }
 0xd7f   :  { %165 = vperm.xlu2 %906, %v131_v37  }
 0xdc9   :  { %v634_v38 = vpop.permute.xlu2 %633 }
 0xdca   :  { %v636_v39 = vsel %vm572_vm3, %v634_v38, %v562_v0 }
 0xdcb   :  { %v647_v40 = vpack.c.bf16 %v636_v39, %v636_v39 }
 0xdcd   :  { %888 = vmatmul.msk.bf16.vlgmr.msra.gmra.mxu1 %vm32_vm0, %v647_v40  ;;  %v798_v40 = vld [vmem:[%s1230_s5 + $0x18] sm:$0xff] }
 0xdce   :  { %818 = vmatpush.msra.mxu3 %v798_v40 }
 0xdd1   :  { %v687_v41 = vpop.permute.xlu2 %686 }
 0xdd9   :  { %v166_v42 = vpop.permute.xlu2 %165 }
 0xdda   :  { %180 = vst.msk [vmem:[#allocation5 + $0x30] sm:$0xff] %vm32_vm0, %v166_v42  ;;  %v796_v42 = vld [vmem:[%s1230_s5 + $0x8] sm:$0xff] }
 0xde1   :  { %v645_v6 = vld [vmem:[#allocation5 + $0x30] sm:$0xff] }
 0xde2   :  { %vm646_vm7 = vcmp.ne.f32.partialorder %v645_v6, 0.0 }
 0xe4a   :  { %v660_v45 = vpop.f32.mrf.mxu1 }
 0xe4b   :  { %v664_v46 = vadd.f32 %v660_v45, %v113_v44 }
 0xe4d   :  { %959 = vtanh.f32 %v664_v46  ;;  %v889_v49 = vmul.f32 -1.442695, %v664_v46 }
 0xe4f   :  { %961 = vpow2.f32 %v889_v49 }
 0xe52   :  { %v662_v47 = vpop.f32.mrf.mxu1 }
 0xe53   :  { %v960_v48 = vpop.eup %959 }
 0xe54   :  { %691 = vrot.lane.b32.xlu1 %v960_v48, %s1002_s9 }
 0xe55   :  { %v962_v50 = vpop.eup %961 }
 0xe56   :  { %v668_v51 = vadd.f32 1.0, %v962_v50 }
 0xe58   :  { %963 = vrcp.f32 %v668_v51  ;;  %v680_v57 = vand.u32 2147483648, %v668_v51  ;;  %vm674_vm4 = vweird.f32 %v668_v51  ;;  %v678_v58 = vand.u32 2147483647, %v668_v51 }
 0xe5a   :  { %v681_v60 = vor.u32 1.1754944e-38, %v680_v57  ;;  %vm679_vm6 = vcmp.eq.f32.partialorder %v678_v58, 8.507059e+37 }
 0xe5e   :  { %v964_v52 = vpop.eup %963 }
 0xe5f   :  { %v670_v53 = vmul.f32 %v964_v52, %v668_v51  ;;  %vm675_vm1 = vweird.f32 %v964_v52  ;;  %v910_v51 = vld [vmem:[%s1231_s6] ss:$0 sm:$0xff] }
 0xe60   :  { %vm676_vm5 = vmor %vm674_vm4, %vm675_vm1 }
 0xe61   :  { %v671_v54 = vsub.f32 1.0, %v670_v53 }
 0xe63   :  { %v672_v55 = vmul.f32 %v964_v52, %v671_v54 }
 0xe65   :  { %v673_v56 = vadd.f32 %v964_v52, %v672_v55 }
 0xe67   :  { %v677_v59 = vsel %vm676_vm5, %v964_v52, %v673_v56 }
 0xe68   :  { %v682_v62 = vsel %vm679_vm6, %v681_v60, %v677_v59 }
 0xe69   :  { %v689_v0 = vmul.f32 %v687_v41, %v682_v62  ;;  %v797_v41 = vld [vmem:[%s1230_s5 + $0x10] sm:$0xff] }
 0xe6a   :  { %819 = vmatpush.msra.mxu3 %v797_v41 }
 0xe6c   :  { %820 = vmatpush.msra.mxu3 %v796_v42 }
 0xe6e   :  { %821 = vmatpush.msra.mxu3 %v795_v43 }
 0xec6   :  { %v692_v61 = vpop.permute.xlu1 %691 }
 0xec7   :  { %v694_v63 = vmul.f32 %v692_v61, %v682_v62 }
 0xec9   :  { %696 = vrot.lane.b32.xlu0 %v694_v63, %s1003_s10 }
 0xf3b   :  { %v697_v1 = vpop.permute.xlu0 %696 }
 0xf3c   :  { %v699_v2 = vadd.f32 %v697_v1, %v689_v0 }
 0xf3e   :  { %965 = vtanh.f32 %v699_v2 }
 0xf44   :  { %v966_v3 = vpop.eup %965 }
 0xf45   :  { %702 = vrot.lane.b32.xlu1 %v966_v3, %s1002_s9 }
 0xf4d   :  { %712 = vrot.lane.b32.xlu1 %v699_v2, %s1005_s12 }
 0xfb7   :  { %v703_v4 = vpop.permute.xlu1 %702 }
 0xfb8   :  { %v705_v5 = vmul.f32 %v703_v4, %v682_v62 }
 0xfba   :  { %707 = vrot.lane.b32.xlu0 %v705_v5, %s1003_s10 }
 0xfbf   :  { %v713_v8 = vpop.permute.xlu1 %712 }
 0xfc0   :  { %v1188_v9 = vsel %vm646_vm7, %v713_v8, %v641_v36 }
 0xfc2   :  { %760 = vrot.lane.b32.xlu0 %v1188_v9, %s1003_s10 }
 0xfca   :  { %170 = vperm.xlu0 %907, %v132_v10  }
0x102c   :  { %v708_v11 = vpop.permute.xlu0 %707 }
0x102d   :  { %v710_v12 = vsel %vm646_vm7, %v708_v11, %v636_v39 }
0x102e   :  { %v721_v13 = vpack.c.bf16 %v710_v12, %v710_v12 }
0x1030   :  { %890 = vmatmul.msk.bf16.vlgmr.msra.gmra.mxu2 %vm32_vm0, %v721_v13 }
0x1034   :  { %v761_v14 = vpop.permute.xlu0 %760 }
0x103c   :  { %v171_v15 = vpop.permute.xlu0 %170 }
0x103d   :  { %181 = vst.msk [vmem:[#allocation5 + $0x38] sm:$0xff] %vm32_vm0, %v171_v15 }
0x1044   :  { %v719_v46 = vld [vmem:[#allocation5 + $0x38] sm:$0xff] }
0x1045   :  { %vm720_vm12 = vcmp.ne.f32.partialorder %v719_v46, 0.0 }
0x10b3   :  { %v734_v18 = vpop.f32.mrf.mxu2 }
0x10b4   :  { %v738_v19 = vadd.f32 %v734_v18, %v115_v17 }
0x10b6   :  { %967 = vtanh.f32 %v738_v19  ;;  %v891_v22 = vmul.f32 -1.442695, %v738_v19 }
0x10b8   :  { %969 = vpow2.f32 %v891_v22 }
0x10bb   :  { %v736_v20 = vpop.f32.mrf.mxu2 }
0x10bc   :  { %v968_v21 = vpop.eup %967 }
0x10bd   :  { %765 = vrot.lane.b32.xlu2 %v968_v21, %s1002_s9 }
0x10be   :  { %v970_v23 = vpop.eup %969 }
0x10bf   :  { %v742_v24 = vadd.f32 1.0, %v970_v23 }
0x10c1   :  { %971 = vrcp.f32 %v742_v24  ;;  %v754_v30 = vand.u32 2147483648, %v742_v24  ;;  %vm748_vm9 = vweird.f32 %v742_v24  ;;  %v752_v7 = vand.u32 2147483647, %v742_v24 }
0x10c3   :  { %v755_v32 = vor.u32 1.1754944e-38, %v754_v30  ;;  %vm753_vm11 = vcmp.eq.f32.partialorder %v752_v7, 8.507059e+37 }
0x10c7   :  { %v972_v25 = vpop.eup %971 }
0x10c8   :  { %v744_v26 = vmul.f32 %v972_v25, %v742_v24  ;;  %vm749_vm8 = vweird.f32 %v972_v25 }
0x10c9   :  { %vm750_vm10 = vmor %vm748_vm9, %vm749_vm8 }
0x10ca   :  { %v745_v27 = vsub.f32 1.0, %v744_v26 }
0x10cc   :  { %v746_v28 = vmul.f32 %v972_v25, %v745_v27 }
0x10ce   :  { %v747_v29 = vadd.f32 %v972_v25, %v746_v28 }
0x10d0   :  { %v751_v31 = vsel %vm750_vm10, %v972_v25, %v747_v29 }
0x10d1   :  { %v756_v34 = vsel %vm753_vm11, %v755_v32, %v751_v31 }
0x10d2   :  { %v763_v36 = vmul.f32 %v761_v14, %v756_v34 }
0x1117   :  { %v766_v33 = vpop.permute.xlu2 %765 }
0x1118   :  { %v768_v35 = vmul.f32 %v766_v33, %v756_v34 }
0x111a   :  { %770 = vrot.lane.b32.xlu1 %v768_v35, %s1003_s10 }
0x118c   :  { %v771_v37 = vpop.permute.xlu1 %770 }
0x118d   :  { %v773_v38 = vadd.f32 %v771_v37, %v763_v36 }
0x118f   :  { %973 = vtanh.f32 %v773_v38 }
0x1195   :  { %v974_v39 = vpop.eup %973 }
0x1196   :  { %776 = vrot.lane.b32.xlu2 %v974_v39, %s1002_s9 }
0x119e   :  { %786 = vrot.lane.b32.xlu2 %v773_v38, %s1005_s12  ;;  %s1006_s12 = smov [#allocation6]  }
0x11f0   :  { %v777_v44 = vpop.permute.xlu2 %776 }
0x11f1   :  { %v779_v45 = vmul.f32 %v777_v44, %v756_v34 }
0x11f3   :  { %781 = vrot.lane.b32.xlu1 %v779_v45, %s1003_s10  ;;  %s833_s10 = sshll.u32 %s1006_s12, 4  ;;  %s834_s10 = int_to_ptr.vmem [resolvable:$true] %s833_s10 }
0x11f8   :  { %v787_v47 = vpop.permute.xlu2 %786 }
0x11f9   :  { %v789_v48 = vsel %vm720_vm12, %v787_v47, %v1188_v9 }
0x11fa   :  { %791 = vst.msk [vmem:[#allocation3] sm:$0xff] %vm32_vm0, %v789_v48 }
0x1265   :  { %v782_v49 = vpop.permute.xlu1 %781 }
0x1266   :  { %v784_v50 = vsel %vm720_vm12, %v782_v49, %v710_v12 }
0x1267   :  { %790 = vst.msk [vmem:[#allocation2] sm:$0xff] %vm32_vm0, %v784_v50  ;;  %892 = vmatmul.msk.f32.vlgmr.msra.gmra.mxu3 %vm32_vm0, %v784_v50 }
0x12ea   :  { %v823_v52 = vpop.f32.mrf.mxu3 }
0x12eb   :  { %v824_v53 = vadd.f32 %v910_v51, %v823_v52 }
0x12ed   :  { %v826_v54 = vmax.f32 %v824_v53, 0.0 }
0x12ef   :  { %827 = vst [vmem:[#allocation6] sm:$0xff] %v826_v54 }
0x12f0   :  { %838 = dma.vmem_to_hbm [thread:$0]  %s834_s10, 128, %s836_s18, [#allocation7]  }
0x12f1   :  { %999 = dma.done.wait [#allocation7], 128  }
0x12f2   :  { %1000 = vsyncadd [#allocation7], 4294967168 }
0x12f3   :  { %843 = vsyncpa [#allocation7], 1 }

</bundles_post_ra>
